<compile_context>
chip_gen: v7x
topology: tpu7x:2x2x1
jax: 0.10.0
libtpu: 0.0.40
codegen_flags: <defaults>
</compile_context>

<pallas_src>
import jax
import jax.numpy as jnp
from jax.experimental import pallas as pl
from jax.experimental.pallas import tpu as pltpu


# ----------------------------------------------------------------------------
# Generation-aware configuration
# ----------------------------------------------------------------------------
def _tpu_config():
    """Return (row_tile_max, col_tile_max, vmem_limit_bytes)."""
    vmem = 64 << 20                      # conservative default: assume v7x (64 MiB / TC)
    try:
        info = pltpu.get_tpu_info()
        for name in ("vmem_capacity_bytes", "vmem_size_bytes"):
            v = getattr(info, name, None)
            if isinstance(v, int) and v > 0:
                vmem = v
                break
    except Exception:
        pass
    if vmem >= (100 << 20):              # v5e / v6e: 128 MiB VMEM per core
        return 512, 2048, 96 << 20
    return 256, 1024, 48 << 20           # v7x: 64 MiB VMEM per core


def _round_up(n, m):
    return ((n + m - 1) // m) * m


def _pad_rows_and_tile(b, tm_max):
    """(padded_rows, row_tile): single full-extent block for small b, else tm_max."""
    if b <= tm_max:
        bp = _round_up(b, 8)
        return bp, bp
    bp = _round_up(b, tm_max)
    return bp, tm_max


def _pick_col_tile(bxp, tn_max):
    """Largest multiple of 128 that divides bxp and is <= tn_max (or bxp itself)."""
    if bxp <= tn_max:
        return bxp
    best, t = 128, 128
    while t <= tn_max:
        if bxp % t == 0:
            best = t
        t += 128
    return best


def _pad_rows(a, bp):
    b = a.shape[0]
    if bp == b:
        return a
    return jnp.pad(a, ((0, bp - b), (0, 0)))


def _resident_spec(shape, index_map):
    """BlockSpec for a constant-index (VMEM-resident) operand, single-buffered."""
    buffered = getattr(pl, "Buffered", None)
    if buffered is not None:
        try:
            return pl.BlockSpec(shape, index_map, pipeline_mode=buffered(1))
        except TypeError:
            pass
    return pl.BlockSpec(shape, index_map)


# ----------------------------------------------------------------------------
# Kernel bodies
# ----------------------------------------------------------------------------
def _mlp_chain(h, param_refs, n_linear, use_bf16):
    """Chain of (matmul + bias [+ ReLU]); matmuls on the MXU, f32 accumulation."""
    for li in range(n_linear):
        w = param_refs[2 * li][...]
        b = param_refs[2 * li + 1][...]
        lhs, rhs = h, w
        if use_bf16:
            lhs = lhs.astype(jnp.bfloat16)
            rhs = rhs.astype(jnp.bfloat16)
        h = jnp.dot(lhs, rhs, preferred_element_type=jnp.float32) + b
        if li < n_linear - 1:
            h = jnp.maximum(h, 0.0)           # ReLU on all layers but the last
    return h


def _make_gxt_kernel(n_linear, use_bf16):
    """Row-tile MLP for g(x); emits the tile TRANSPOSED -> lane-dense [E, tm] store."""
    def kernel(*refs):
        x_ref, out_ref = refs[0], refs[-1]
        p = refs[1:-1]
        h = _mlp_chain(x_ref[...], p, n_linear, use_bf16)      # [tm, E] f32
        out_ref[...] = h.T.astype(out_ref.dtype)               # [E, tm]
    return kernel


def _make_scores_kernel(n_linear, use_bf16):
    """Fused h(y_tile) MLP (cached in scratch) + column-tiled contraction with gxT."""
    def kernel(*refs):
        y_ref, gxt_ref = refs[0], refs[1]                      # [tm, D], [E, tn]
        out_ref, hy_ref = refs[-2], refs[-1]                   # [tm, tn], scratch [tm, E]
        p = refs[2:-2]

        @pl.when(pl.program_id(1) == 0)                        # once per row tile
        def _():
            hy_ref[...] = _mlp_chain(y_ref[...], p, n_linear, use_bf16)

        lhs, rhs = hy_ref[...], gxt_ref[...]
        if use_bf16:
            lhs = lhs.astype(jnp.bfloat16)
            rhs = rhs.astype(jnp.bfloat16)
        out_ref[...] = jnp.dot(
            lhs, rhs, preferred_element_type=jnp.float32).astype(out_ref.dtype)
    return kernel


def _make_fused_small_kernel(n_g, n_h, use_bf16):
    """Single-launch path for small batches: g(x), h(y) and the contraction fused."""
    def kernel(*refs):
        x_ref, y_ref, out_ref = refs[0], refs[1], refs[-1]
        p = refs[2:-1]
        gp, hp = p[:2 * n_g], p[2 * n_g:]
        gx = _mlp_chain(x_ref[...], gp, n_g, use_bf16)         # [Bx, E]
        hy = _mlp_chain(y_ref[...], hp, n_h, use_bf16)         # [By, E]
        lhs, rhs = hy, gx
        if use_bf16:
            lhs = lhs.astype(jnp.bfloat16)
            rhs = rhs.astype(jnp.bfloat16)
        # scores[i, j] = hy[i] . gx[j] : contract last dims (tiny, transpose-free).
        out_ref[...] = jax.lax.dot_general(
            lhs, rhs, (((1,), (1,)), ((), ())),
            preferred_element_type=jnp.float32).astype(out_ref.dtype)
    return kernel


# ----------------------------------------------------------------------------
# pallas_call wrappers
# ----------------------------------------------------------------------------
def _mlp_flops(rows, d, hdim, e, n_linear):
    inner = n_linear - 2
    return 2 * rows * (d * hdim + inner * hdim * hdim + hdim * e)


def _gxt_forward(xp, params, tm, vmem_limit, use_bf16):
    """Row-tiled MLP producing gxT [E, Bxp]."""
    bp, d = xp.shape
    hdim = params[0][0].shape[1]
    e = params[-1][0].shape[1]
    flat = [a for wb in params for a in wb]
    n_linear = len(params)

    in_specs = [pl.BlockSpec((tm, d), lambda i: (i, 0))]
    for a in flat:
        in_specs.append(_resident_spec(a.shape, lambda i: (0, 0)))

    pbytes = 4 * sum(a.size for a in flat)
    cost = pl.CostEstimate(
        flops=_mlp_flops(bp, d, hdim, e, n_linear),
        transcendentals=0,
        bytes_accessed=4 * (bp * d + e * bp) + pbytes)

    return pl.pallas_call(
        _make_gxt_kernel(n_linear, use_bf16),
        out_shape=jax.ShapeDtypeStruct((e, bp), jnp.float32),
        grid=(bp // tm,),
        in_specs=in_specs,
        out_specs=pl.BlockSpec((e, tm), lambda i: (0, i)),
        compiler_params=pltpu.CompilerParams(
            dimension_semantics=("parallel",),
            vmem_limit_bytes=vmem_limit),
        cost_estimate=cost,
    )(xp, *flat)


def _scores_forward(yp, gxt, params, tmy, tn, vmem_limit, use_bf16):
    """Fused h(y) MLP + column-tiled contraction against gxT."""
    byp, d = yp.shape
    e, bxp = gxt.shape
    hdim = params[0][0].shape[1]
    flat = [a for wb in params for a in wb]
    n_linear = len(params)
    n_col = bxp // tn

    in_specs = [pl.BlockSpec((tmy, d), lambda i, j: (i, 0))]
    if n_col == 1:
        in_specs.append(_resident_spec((e, tn), lambda i, j: (0, 0)))
    else:
        in_specs.append(pl.BlockSpec((e, tn), lambda i, j: (0, j)))
    for a in flat:
        in_specs.append(_resident_spec(a.shape, lambda i, j: (0, 0)))

    pbytes = 4 * sum(a.size for a in flat)
    cost = pl.CostEstimate(
        flops=_mlp_flops(byp, d, hdim, e, n_linear) + 2 * byp * bxp * e,
        transcendentals=0,
        bytes_accessed=4 * (byp * d + e * bxp + byp * bxp) + pbytes)

    return pl.pallas_call(
        _make_scores_kernel(n_linear, use_bf16),
        out_shape=jax.ShapeDtypeStruct((byp, bxp), jnp.float32),
        grid=(byp // tmy, n_col),
        in_specs=in_specs,
        out_specs=pl.BlockSpec((tmy, tn), lambda i, j: (i, j)),
        scratch_shapes=[pltpu.VMEM((tmy, e), jnp.float32)],
        compiler_params=pltpu.CompilerParams(
            dimension_semantics=("parallel", "arbitrary"),
            vmem_limit_bytes=vmem_limit),
        cost_estimate=cost,
    )(yp, gxt, *flat)


def _fused_small_forward(x, y, g_params, h_params, use_bf16):
    """Single pallas_call for small batches (everything fits one block)."""
    bx, d = x.shape
    by = y.shape[0]
    hdim = g_params[0][0].shape[1]
    e = g_params[-1][0].shape[1]
    bxp, byp = _round_up(bx, 8), _round_up(by, 8)
    xp, yp = _pad_rows(x, bxp), _pad_rows(y, byp)

    g_flat = [a for wb in g_params for a in wb]
    h_flat = [a for wb in h_params for a in wb]
    pbytes = 4 * (sum(a.size for a in g_flat) + sum(a.size for a in h_flat))
    cost = pl.CostEstimate(
        flops=_mlp_flops(bxp, d, hdim, e, len(g_params))
              + _mlp_flops(byp, d, hdim, e, len(h_params))
              + 2 * byp * bxp * e,
        transcendentals=0,
        bytes_accessed=4 * (bxp * d + byp * d + byp * bxp) + pbytes)

    scores = pl.pallas_call(
        _make_fused_small_kernel(len(g_params), len(h_params), use_bf16),
        out_shape=jax.ShapeDtypeStruct((byp, bxp), jnp.float32),
        cost_estimate=cost,
    )(xp, yp, *g_flat, *h_flat)
    return scores[:by, :bx]


def separable_critic_forward(x, y, g_params, h_params, *, use_bf16=False):
    """scores = h(y) @ g(x).T  (same semantics as SeparableCritic.forward)."""
    bx = x.shape[0]
    by = y.shape[0]
    tm_max, tn_max, vmem_limit = _tpu_config()

    # Small-batch fast path: one fused kernel, no gx HBM round trip.
    if bx <= tm_max and by <= tm_max:
        return _fused_small_forward(x, y, g_params, h_params, use_bf16)

    # Large-batch path: row-tiled gxT kernel + column-tiled fused scores kernel.
    bxp, tmx = _pad_rows_and_tile(bx, tm_max)
    byp, tmy = _pad_rows_and_tile(by, tm_max)
    xp, yp = _pad_rows(x, bxp), _pad_rows(y, byp)

    gxt = _gxt_forward(xp, g_params, tmx, vmem_limit, use_bf16)     # [E, bxp]
    tn = _pick_col_tile(bxp, tn_max)
    scores = _scores_forward(yp, gxt, h_params, tmy, tn, vmem_limit, use_bf16)
    return scores[:by, :bx]


# ----------------------------------------------------------------------------
# Parameter init (deterministic, mirrors nn.Linear default init)
# ----------------------------------------------------------------------------
def init_mlp_params(key, dim, hidden_dim, output_dim, layers):
    """Shapes follow mlp(dim, hidden_dim, output_dim, layers, 'relu')."""
    sizes = [(dim, hidden_dim)] + [(hidden_dim, hidden_dim)] * layers \
            + [(hidden_dim, output_dim)]
    params = []
    for fan_in, fan_out in sizes:
        key, kw, kb = jax.random.split(key, 3)
        bound = 1.0 / jnp.sqrt(jnp.float32(fan_in))
        w = jax.random.uniform(kw, (fan_in, fan_out), jnp.float32, -bound, bound)
        b = jax.random.uniform(kb, (1, fan_out), jnp.float32, -bound, bound)
        params.append((w, b))
    return params


# ----------------------------------------------------------------------------
# Pure-JAX reference mirroring the PyTorch module
# ----------------------------------------------------------------------------
def _ref_forward(x, y, g_params, h_params):
    def mlp_ref(z, params):
        h = z
        for i, (w, b) in enumerate(params):
            h = h @ w + b
            if i < len(params) - 1:
                h = jnp.maximum(h, 0.0)
        return h
    return mlp_ref(y, h_params) @ mlp_ref(x, g_params).T


if __name__ == "__main__":
    B = 8              # batch
    dim = 16           # x / y feature dim (module uses `dim` for both)
    hidden_dim = 32
    embed_dim = 16
    layers = 2         # -> 4 Linear layers per MLP

    key = jax.random.PRNGKey(0)
    kx, ky, kg, kh = jax.random.split(key, 4)
    x = jax.random.normal(kx, (B, dim), jnp.float32)
    y = jax.random.normal(ky, (B, dim), jnp.float32)
    g_params = init_mlp_params(kg, dim, hidden_dim, embed_dim, layers)
    h_params = init_mlp_params(kh, dim, hidden_dim, embed_dim, layers)

    out = separable_critic_forward(x, y, g_params, h_params)
    out = jax.block_until_ready(out)

    ref = _ref_forward(x, y, g_params, h_params)
    assert out.shape == (B, B)
    assert jnp.allclose(out, ref, atol=1e-5, rtol=1e-5)

    print("KERNEL_OK")
</pallas_src>

<mosaic_0001>
module attributes {stable_mosaic.version = 11 : i64} {
  func.func @kernel(%arg0: memref<8x16xf32, #tpu.memory_space<vmem>>, %arg1: memref<8x16xf32, #tpu.memory_space<vmem>>, %arg2: memref<16x32xf32, #tpu.memory_space<vmem>>, %arg3: memref<1x32xf32, #tpu.memory_space<vmem>>, %arg4: memref<32x32xf32, #tpu.memory_space<vmem>>, %arg5: memref<1x32xf32, #tpu.memory_space<vmem>>, %arg6: memref<32x32xf32, #tpu.memory_space<vmem>>, %arg7: memref<1x32xf32, #tpu.memory_space<vmem>>, %arg8: memref<32x16xf32, #tpu.memory_space<vmem>>, %arg9: memref<1x16xf32, #tpu.memory_space<vmem>>, %arg10: memref<16x32xf32, #tpu.memory_space<vmem>>, %arg11: memref<1x32xf32, #tpu.memory_space<vmem>>, %arg12: memref<32x32xf32, #tpu.memory_space<vmem>>, %arg13: memref<1x32xf32, #tpu.memory_space<vmem>>, %arg14: memref<32x32xf32, #tpu.memory_space<vmem>>, %arg15: memref<1x32xf32, #tpu.memory_space<vmem>>, %arg16: memref<32x16xf32, #tpu.memory_space<vmem>>, %arg17: memref<1x16xf32, #tpu.memory_space<vmem>>, %arg18: memref<8x8xf32, #tpu.memory_space<vmem>>) attributes {dimension_semantics = [], scalar_prefetch = 0 : i64, scratch_operands = 0 : i64, tpu.core_type = #tpu.core_type<tc>} {
    %c0 = arith.constant 0 : index
    %c0_0 = arith.constant 0 : index
    %0 = vector.load %arg0[%c0, %c0_0] : memref<8x16xf32, #tpu.memory_space<vmem>>, vector<8x16xf32>
    %c0_1 = arith.constant 0 : index
    %c0_2 = arith.constant 0 : index
    %1 = vector.load %arg2[%c0_1, %c0_2] : memref<16x32xf32, #tpu.memory_space<vmem>>, vector<16x32xf32>
    %c0_3 = arith.constant 0 : index
    %c0_4 = arith.constant 0 : index
    %2 = vector.load %arg3[%c0_3, %c0_4] : memref<1x32xf32, #tpu.memory_space<vmem>>, vector<1x32xf32>
    %cst = arith.constant dense<0.000000e+00> : vector<8x32xf32>
    %3 = tpu.matmul %0, %1, %cst {dimension_numbers = #tpu.dot_dimension_numbers<[1], [0], [0], [1], [0, 0, 1, 1], [], []>} : vector<8x16xf32>, vector<16x32xf32>, vector<8x32xf32> -> vector<8x32xf32>
    %4 = vector.broadcast %2 : vector<1x32xf32> to vector<8x32xf32>
    %5 = arith.addf %3, %4 : vector<8x32xf32>
    %cst_5 = arith.constant 0.000000e+00 : f32
    %6 = vector.broadcast %cst_5 : f32 to vector<8x32xf32>
    %7 = arith.maximumf %5, %6 : vector<8x32xf32>
    %c0_6 = arith.constant 0 : index
    %c0_7 = arith.constant 0 : index
    %8 = vector.load %arg4[%c0_6, %c0_7] : memref<32x32xf32, #tpu.memory_space<vmem>>, vector<32x32xf32>
    %c0_8 = arith.constant 0 : index
    %c0_9 = arith.constant 0 : index
    %9 = vector.load %arg5[%c0_8, %c0_9] : memref<1x32xf32, #tpu.memory_space<vmem>>, vector<1x32xf32>
    %cst_10 = arith.constant dense<0.000000e+00> : vector<8x32xf32>
    %10 = tpu.matmul %7, %8, %cst_10 {dimension_numbers = #tpu.dot_dimension_numbers<[1], [0], [0], [1], [0, 0, 1, 1], [], []>} : vector<8x32xf32>, vector<32x32xf32>, vector<8x32xf32> -> vector<8x32xf32>
    %11 = vector.broadcast %9 : vector<1x32xf32> to vector<8x32xf32>
    %12 = arith.addf %10, %11 : vector<8x32xf32>
    %cst_11 = arith.constant 0.000000e+00 : f32
    %13 = vector.broadcast %cst_11 : f32 to vector<8x32xf32>
    %14 = arith.maximumf %12, %13 : vector<8x32xf32>
    %c0_12 = arith.constant 0 : index
    %c0_13 = arith.constant 0 : index
    %15 = vector.load %arg6[%c0_12, %c0_13] : memref<32x32xf32, #tpu.memory_space<vmem>>, vector<32x32xf32>
    %c0_14 = arith.constant 0 : index
    %c0_15 = arith.constant 0 : index
    %16 = vector.load %arg7[%c0_14, %c0_15] : memref<1x32xf32, #tpu.memory_space<vmem>>, vector<1x32xf32>
    %cst_16 = arith.constant dense<0.000000e+00> : vector<8x32xf32>
    %17 = tpu.matmul %14, %15, %cst_16 {dimension_numbers = #tpu.dot_dimension_numbers<[1], [0], [0], [1], [0, 0, 1, 1], [], []>} : vector<8x32xf32>, vector<32x32xf32>, vector<8x32xf32> -> vector<8x32xf32>
    %18 = vector.broadcast %16 : vector<1x32xf32> to vector<8x32xf32>
    %19 = arith.addf %17, %18 : vector<8x32xf32>
    %cst_17 = arith.constant 0.000000e+00 : f32
    %20 = vector.broadcast %cst_17 : f32 to vector<8x32xf32>
    %21 = arith.maximumf %19, %20 : vector<8x32xf32>
    %c0_18 = arith.constant 0 : index
    %c0_19 = arith.constant 0 : index
    %22 = vector.load %arg8[%c0_18, %c0_19] : memref<32x16xf32, #tpu.memory_space<vmem>>, vector<32x16xf32>
    %c0_20 = arith.constant 0 : index
    %c0_21 = arith.constant 0 : index
    %23 = vector.load %arg9[%c0_20, %c0_21] : memref<1x16xf32, #tpu.memory_space<vmem>>, vector<1x16xf32>
    %cst_22 = arith.constant dense<0.000000e+00> : vector<8x16xf32>
    %24 = tpu.matmul %21, %22, %cst_22 {dimension_numbers = #tpu.dot_dimension_numbers<[1], [0], [0], [1], [0, 0, 1, 1], [], []>} : vector<8x32xf32>, vector<32x16xf32>, vector<8x16xf32> -> vector<8x16xf32>
    %25 = vector.broadcast %23 : vector<1x16xf32> to vector<8x16xf32>
    %26 = arith.addf %24, %25 : vector<8x16xf32>
    %c0_23 = arith.constant 0 : index
    %c0_24 = arith.constant 0 : index
    %27 = vector.load %arg1[%c0_23, %c0_24] : memref<8x16xf32, #tpu.memory_space<vmem>>, vector<8x16xf32>
    %c0_25 = arith.constant 0 : index
    %c0_26 = arith.constant 0 : index
    %28 = vector.load %arg10[%c0_25, %c0_26] : memref<16x32xf32, #tpu.memory_space<vmem>>, vector<16x32xf32>
    %c0_27 = arith.constant 0 : index
    %c0_28 = arith.constant 0 : index
    %29 = vector.load %arg11[%c0_27, %c0_28] : memref<1x32xf32, #tpu.memory_space<vmem>>, vector<1x32xf32>
    %cst_29 = arith.constant dense<0.000000e+00> : vector<8x32xf32>
    %30 = tpu.matmul %27, %28, %cst_29 {dimension_numbers = #tpu.dot_dimension_numbers<[1], [0], [0], [1], [0, 0, 1, 1], [], []>} : vector<8x16xf32>, vector<16x32xf32>, vector<8x32xf32> -> vector<8x32xf32>
    %31 = vector.broadcast %29 : vector<1x32xf32> to vector<8x32xf32>
    %32 = arith.addf %30, %31 : vector<8x32xf32>
    %cst_30 = arith.constant 0.000000e+00 : f32
    %33 = vector.broadcast %cst_30 : f32 to vector<8x32xf32>
    %34 = arith.maximumf %32, %33 : vector<8x32xf32>
    %c0_31 = arith.constant 0 : index
    %c0_32 = arith.constant 0 : index
    %35 = vector.load %arg12[%c0_31, %c0_32] : memref<32x32xf32, #tpu.memory_space<vmem>>, vector<32x32xf32>
    %c0_33 = arith.constant 0 : index
    %c0_34 = arith.constant 0 : index
    %36 = vector.load %arg13[%c0_33, %c0_34] : memref<1x32xf32, #tpu.memory_space<vmem>>, vector<1x32xf32>
    %cst_35 = arith.constant dense<0.000000e+00> : vector<8x32xf32>
    %37 = tpu.matmul %34, %35, %cst_35 {dimension_numbers = #tpu.dot_dimension_numbers<[1], [0], [0], [1], [0, 0, 1, 1], [], []>} : vector<8x32xf32>, vector<32x32xf32>, vector<8x32xf32> -> vector<8x32xf32>
    %38 = vector.broadcast %36 : vector<1x32xf32> to vector<8x32xf32>
    %39 = arith.addf %37, %38 : vector<8x32xf32>
    %cst_36 = arith.constant 0.000000e+00 : f32
    %40 = vector.broadcast %cst_36 : f32 to vector<8x32xf32>
    %41 = arith.maximumf %39, %40 : vector<8x32xf32>
    %c0_37 = arith.constant 0 : index
    %c0_38 = arith.constant 0 : index
    %42 = vector.load %arg14[%c0_37, %c0_38] : memref<32x32xf32, #tpu.memory_space<vmem>>, vector<32x32xf32>
    %c0_39 = arith.constant 0 : index
    %c0_40 = arith.constant 0 : index
    %43 = vector.load %arg15[%c0_39, %c0_40] : memref<1x32xf32, #tpu.memory_space<vmem>>, vector<1x32xf32>
    %cst_41 = arith.constant dense<0.000000e+00> : vector<8x32xf32>
    %44 = tpu.matmul %41, %42, %cst_41 {dimension_numbers = #tpu.dot_dimension_numbers<[1], [0], [0], [1], [0, 0, 1, 1], [], []>} : vector<8x32xf32>, vector<32x32xf32>, vector<8x32xf32> -> vector<8x32xf32>
    %45 = vector.broadcast %43 : vector<1x32xf32> to vector<8x32xf32>
    %46 = arith.addf %44, %45 : vector<8x32xf32>
    %cst_42 = arith.constant 0.000000e+00 : f32
    %47 = vector.broadcast %cst_42 : f32 to vector<8x32xf32>
    %48 = arith.maximumf %46, %47 : vector<8x32xf32>
    %c0_43 = arith.constant 0 : index
    %c0_44 = arith.constant 0 : index
    %49 = vector.load %arg16[%c0_43, %c0_44] : memref<32x16xf32, #tpu.memory_space<vmem>>, vector<32x16xf32>
    %c0_45 = arith.constant 0 : index
    %c0_46 = arith.constant 0 : index
    %50 = vector.load %arg17[%c0_45, %c0_46] : memref<1x16xf32, #tpu.memory_space<vmem>>, vector<1x16xf32>
    %cst_47 = arith.constant dense<0.000000e+00> : vector<8x16xf32>
    %51 = tpu.matmul %48, %49, %cst_47 {dimension_numbers = #tpu.dot_dimension_numbers<[1], [0], [0], [1], [0, 0, 1, 1], [], []>} : vector<8x32xf32>, vector<32x16xf32>, vector<8x16xf32> -> vector<8x16xf32>
    %52 = vector.broadcast %50 : vector<1x16xf32> to vector<8x16xf32>
    %53 = arith.addf %51, %52 : vector<8x16xf32>
    %cst_48 = arith.constant dense<0.000000e+00> : vector<8x8xf32>
    %54 = tpu.matmul %53, %26, %cst_48 {dimension_numbers = #tpu.dot_dimension_numbers<[1], [1], [0], [0], [0, 0, 1, 0], [], []>} : vector<8x16xf32>, vector<8x16xf32>, vector<8x8xf32> -> vector<8x8xf32>
    %c0_49 = arith.constant 0 : index
    %c0_50 = arith.constant 0 : index
    %55 = vector.load %arg18[%c0_49, %c0_50] : memref<8x8xf32, #tpu.memory_space<vmem>>, vector<8x8xf32>
    tpu.vector_store %arg18[%c0_49, %c0_50], %54 {strides = array<i32>} : memref<8x8xf32, #tpu.memory_space<vmem>>, vector<8x8xf32>,
    return
  }
}

</mosaic_0001>

<bundles_post_ra>
// kernel: tpu_custom_call.1
= control target key start
LH: loop header
LB: loop body
LE: loop exit
PB: predicated region body
PF: predicated region fallthrough
CT: control target
= control target key end

     0   :  { %s1747_s0 = inlined_call_operand.hbm [shape: f32[8,16], index: 0, kind: input, shape index: {}]   ;;  %s1748_s1 = inlined_call_operand.hbm [shape: f32[8,16], index: 1, kind: input, shape index: {}]   ;;  %s1749_s2 = inlined_call_operand.hbm [shape: f32[16,32], index: 2, kind: input, shape index: {}]   ;;  %s1750_s3 = inlined_call_operand.vmem [shape: f32[1,32], index: 3, kind: input, shape index: {}]   ;;  %s1751_s4 = inlined_call_operand.vmem [shape: f32[32,32], index: 4, kind: input, shape index: {}]   ;;  %s1752_s5 = inlined_call_operand.hbm [shape: f32[1,32], index: 5, kind: input, shape index: {}]   ;;  %s1753_s6 = inlined_call_operand.vmem [shape: f32[32,32], index: 6, kind: input, shape index: {}]   ;;  %s1754_s7 = inlined_call_operand.hbm [shape: f32[1,32], index: 7, kind: input, shape index: {}]   ;;  %s1755_s8 = inlined_call_operand.vmem [shape: f32[32,16], index: 8, kind: input, shape index: {}]   ;;  %s1756_s9 = inlined_call_operand.hbm [shape: f32[1,16], index: 9, kind: input, shape index: {}]   ;;  %s1757_s10 = inlined_call_operand.hbm [shape: f32[16,32], index: 10, kind: input, shape index: {}]   ;;  %s1758_s11 = inlined_call_operand.hbm [shape: f32[1,32], index: 11, kind: input, shape index: {}]   ;;  %s1759_s12 = inlined_call_operand.vmem [shape: f32[32,32], index: 12, kind: input, shape index: {}]   ;;  %s1760_s13 = inlined_call_operand.hbm [shape: f32[1,32], index: 13, kind: input, shape index: {}]   ;;  %s1761_s14 = inlined_call_operand.vmem [shape: f32[32,32], index: 14, kind: input, shape index: {}]   ;;  %s1762_s15 = inlined_call_operand.vmem [shape: f32[1,32], index: 15, kind: input, shape index: {}]   ;;  %s1763_s16 = inlined_call_operand.vmem [shape: f32[32,16], index: 16, kind: input, shape index: {}]   ;;  %s1764_s17 = inlined_call_operand.vmem [shape: f32[1,16], index: 17, kind: input, shape index: {}]   ;;  %s1765_s18 = inlined_call_operand.hbm [shape: f32[8,8], index: 18, kind: output, shape index: {}]  }
   0x1   :  { %1769 = sst [smem:[#allocation24_spill]] %s1747_s0 }
   0x2   :  { %1770 = sst [smem:[#allocation25_spill]] %s1748_s1 }
   0x3   :  { %1771 = sst [smem:[#allocation26_spill]] %s1749_s2 }
   0x4   :  { %23 = vsyncpa [#allocation3], 0 }
   0x5   :  { %24 = vsyncpa [#allocation6], 0 }
   0x6   :  { %25 = vsyncpa [#allocation9], 0 }
   0x7   :  { %26 = vsyncpa [#allocation12], 0 }
   0x8   :  { %27 = vsyncpa [#allocation15], 0 }
   0x9   :  { %28 = vsyncpa [#allocation4], 0  ;;  %s1373_s27 = smov [#allocation5]   ;;  %s1374_s29 = smov [#allocation8]  }
   0xa   :  { %s45_s28 = sshll.u32 %s1373_s27, 4  ;;  %s71_s30 = sshll.u32 %s1374_s29, 4  ;;  %s46_s28 = int_to_ptr.vmem [resolvable:$true] %s45_s28  ;;  %s72_s30 = int_to_ptr.vmem [resolvable:$true] %s71_s30 }
   0xb   :  { %s1772_s1 = sld [smem:[#allocation25_spill]] }
  0x11   :  { %s1141_s20 = scalar_lea.hbm %s1772_s1, 128 }
  0x12   :  { %p1142_p0 = scmp.ne.s32.totalorder %s1772_s1, %s1141_s20  ;;  %p1145_p1 = scmp.lt.u32.totalorder %s1141_s20, %s1772_s1 }
  0x14   :  { %p1147_p2 = pnand %p1145_p1, %p1142_p0 }
  0x16   :  { %1150 = shalt.err (!%p1147_p2)
}
  0x17   :  { %s1151_s24 = scalar_lea.vmem %s46_s28, 128  ;;  %p1156_p4 = scmp.lt.s32.totalorder %s46_s28, %s46_s28 }
  0x18   :  { %p1152_p3 = scmp.ne.s32.totalorder %s46_s28, %s1151_s24  ;;  %p1157_p5 = scmp.lt.s32.totalorder %s1151_s24, %s1151_s24 }
  0x1a   :  { %p1158_p6 = por %p1157_p5, %p1156_p4 }
  0x1c   :  { %p1159_p7 = pnand %p1158_p6, %p1152_p3 }
  0x1e   :  { %1162 = shalt.err (!%p1159_p7)
}
  0x1f   :  { %48 = dma.hbm_to_vmem [thread:$0]  %s1772_s1, 128, %s46_s28, [#allocation6]  }
  0x20   :  { %s1163_s0 = scalar_lea.hbm %s1752_s5, 16 }
  0x21   :  { %p1164_p8 = scmp.ne.s32.totalorder %s1752_s5, %s1163_s0  ;;  %p1167_p9 = scmp.lt.u32.totalorder %s1163_s0, %s1752_s5 }
  0x23   :  { %p1169_p10 = pnand %p1167_p9, %p1164_p8 }
  0x25   :  { %1172 = shalt.err (!%p1169_p10)
}
  0x26   :  { %s1173_s2 = scalar_lea.vmem %s72_s30, 16  ;;  %s1177_s23 = scalar_lea.vmem %s72_s30, 32 }
  0x27   :  { %p1174_p11 = scmp.ne.s32.totalorder %s72_s30, %s1173_s2  ;;  %p1178_p12 = scmp.lt.s32.totalorder %s72_s30, %s72_s30 }
  0x28   :  { %p1179_p13 = scmp.lt.s32.totalorder %s1177_s23, %s1173_s2 }
  0x2a   :  { %p1180_p0 = por %p1179_p13, %p1178_p12 }
  0x2c   :  { %p1181_p1 = pnand %p1180_p0, %p1174_p11 }
  0x2e   :  { %1184 = shalt.err (!%p1181_p1)
}
  0x2f   :  { %74 = dma.hbm_to_vmem [thread:$0]  %s1752_s5, 16, %s72_s30, [#allocation9]  }
  0x30   :  { %s1375_s24 = smov [#allocation11]   ;;  %s1376_s26 = smov [#allocation14]  }
  0x31   :  { %s95_s25 = sshll.u32 %s1375_s24, 4  ;;  %s117_s27 = sshll.u32 %s1376_s26, 4  ;;  %s96_s25 = int_to_ptr.vmem [resolvable:$true] %s95_s25  ;;  %s118_s27 = int_to_ptr.vmem [resolvable:$true] %s117_s27 }
  0x32   :  { %s1185_s19 = scalar_lea.hbm %s1756_s9, 16 }
  0x33   :  { %p1186_p2 = scmp.ne.s32.totalorder %s1756_s9, %s1185_s19  ;;  %p1189_p3 = scmp.lt.u32.totalorder %s1185_s19, %s1756_s9 }
  0x35   :  { %p1191_p4 = pnand %p1189_p3, %p1186_p2 }
  0x37   :  { %1194 = shalt.err (!%p1191_p4)
}
  0x38   :  { %s1195_s5 = scalar_lea.vmem %s96_s25, 16  ;;  %s1199_s30 = scalar_lea.vmem %s96_s25, 32 }
  0x39   :  { %p1196_p5 = scmp.ne.s32.totalorder %s96_s25, %s1195_s5  ;;  %p1200_p6 = scmp.lt.s32.totalorder %s96_s25, %s96_s25 }
  0x3a   :  { %p1201_p7 = scmp.lt.s32.totalorder %s1199_s30, %s1195_s5 }
  0x3c   :  { %p1202_p8 = por %p1201_p7, %p1200_p6 }
  0x3e   :  { %p1203_p9 = pnand %p1202_p8, %p1196_p5 }
  0x40   :  { %1206 = shalt.err (!%p1203_p9)
}
  0x41   :  { %98 = dma.hbm_to_vmem [thread:$0]  %s1756_s9, 16, %s96_s25, [#allocation12]  }
  0x42   :  { %s1207_s26 = scalar_lea.hbm %s1758_s11, 16 }
  0x43   :  { %p1208_p10 = scmp.ne.s32.totalorder %s1758_s11, %s1207_s26  ;;  %p1211_p11 = scmp.lt.u32.totalorder %s1207_s26, %s1758_s11 }
  0x45   :  { %p1213_p12 = pnand %p1211_p11, %p1208_p10 }
  0x47   :  { %1216 = shalt.err (!%p1213_p12)
}
  0x48   :  { %s1217_s20 = scalar_lea.vmem %s118_s27, 16  ;;  %s1221_s22 = scalar_lea.vmem %s118_s27, 32 }
  0x49   :  { %p1218_p13 = scmp.ne.s32.totalorder %s118_s27, %s1217_s20  ;;  %p1222_p0 = scmp.lt.s32.totalorder %s118_s27, %s118_s27 }
  0x4a   :  { %p1223_p1 = scmp.lt.s32.totalorder %s1221_s22, %s1217_s20 }
  0x4c   :  { %p1224_p2 = por %p1223_p1, %p1222_p0 }
  0x4e   :  { %p1225_p3 = pnand %p1224_p2, %p1218_p13 }
  0x50   :  { %1228 = shalt.err (!%p1225_p3)
}
  0x51   :  { %120 = dma.hbm_to_vmem [thread:$0]  %s1758_s11, 16, %s118_s27, [#allocation15]  }
  0x52   :  { %s1377_s2 = smov [#allocation2]   ;;  %s1378_s30 = smov [#allocation7]  }
  0x53   :  { %s35_s5 = sshll.u32 %s1377_s2, 4  ;;  %s54_s23 = sshll.u32 %s1378_s30, 4  ;;  %s36_s5 = int_to_ptr.vmem [resolvable:$true] %s35_s5  ;;  %s1531_s23 = int_to_ptr.vmem [resolvable:$true] %s54_s23 }
  0x54   :  { %s1773_s24 = sld [smem:[#allocation24_spill]] }
  0x5a   :  { %s1229_s26 = scalar_lea.hbm %s1773_s24, 128 }
  0x5b   :  { %p1230_p4 = scmp.ne.s32.totalorder %s1773_s24, %s1229_s26  ;;  %p1233_p5 = scmp.lt.u32.totalorder %s1229_s26, %s1773_s24 }
  0x5d   :  { %p1235_p6 = pnand %p1233_p5, %p1230_p4 }
  0x5f   :  { %1238 = shalt.err (!%p1235_p6)
}
  0x60   :  { %s1239_s11 = scalar_lea.vmem %s36_s5, 128  ;;  %p1244_p8 = scmp.lt.s32.totalorder %s36_s5, %s36_s5 }
  0x61   :  { %p1240_p7 = scmp.ne.s32.totalorder %s36_s5, %s1239_s11  ;;  %p1245_p9 = scmp.lt.s32.totalorder %s1239_s11, %s1239_s11 }
  0x63   :  { %p1246_p10 = por %p1245_p9, %p1244_p8 }
  0x65   :  { %p1247_p11 = pnand %p1246_p10, %p1240_p7 }
  0x67   :  { %1250 = shalt.err (!%p1247_p11)
}
  0x68   :  { %38 = dma.hbm_to_vmem [thread:$0]  %s1773_s24, 128, %s36_s5, [#allocation3]  }
  0x69   :  { %s1774_s25 = sld [smem:[#allocation26_spill]] }
  0x6f   :  { %s1251_s2 = scalar_lea.hbm %s1774_s25, 256 }
  0x70   :  { %p1252_p12 = scmp.ne.s32.totalorder %s1774_s25, %s1251_s2  ;;  %p1255_p13 = scmp.lt.u32.totalorder %s1251_s2, %s1774_s25 }
  0x72   :  { %p1257_p0 = pnand %p1255_p13, %p1252_p12 }
  0x74   :  { %1260 = shalt.err (!%p1257_p0)
}
  0x75   :  { %s1261_s29 = scalar_lea.vmem %s1531_s23, 256  ;;  %p1266_p2 = scmp.lt.s32.totalorder %s1531_s23, %s1531_s23 }
  0x76   :  { %p1262_p1 = scmp.ne.s32.totalorder %s1531_s23, %s1261_s29  ;;  %p1267_p3 = scmp.lt.s32.totalorder %s1261_s29, %s1261_s29 }
  0x78   :  { %p1268_p4 = por %p1267_p3, %p1266_p2 }
  0x7a   :  { %p1269_p5 = pnand %p1268_p4, %p1262_p1 }
  0x7c   :  { %1272 = shalt.err (!%p1269_p5)
}
  0x7d   :  { %s1379_s5 = smov 128   ;;  %s1380_s24 = smov 8  }
  0x7e   :  { %60 = dma.hbm_to_vmem [thread:$0]  %s1774_s25, 256, %s1531_s23, [#allocation6], %s1379_s5, %s1379_s5, %s1380_s24  }
  0x7f   :  { %s1381_s21 = smov [#allocation10]   ;;  %s1382_s27 = smov [#allocation13]  }
  0x80   :  { %s83_s11 = sshll.u32 %s1381_s21, 4  ;;  %s104_s20 = sshll.u32 %s1382_s27, 4  ;;  %s84_s11 = int_to_ptr.vmem [resolvable:$true] %s83_s11  ;;  %s1565_s20 = int_to_ptr.vmem [resolvable:$true] %s104_s20 }
  0x81   :  { %s1273_s2 = scalar_lea.hbm %s1754_s7, 16 }
  0x82   :  { %p1274_p6 = scmp.ne.s32.totalorder %s1754_s7, %s1273_s2  ;;  %p1277_p7 = scmp.lt.u32.totalorder %s1273_s2, %s1754_s7 }
  0x84   :  { %p1279_p8 = pnand %p1277_p7, %p1274_p6 }
  0x86   :  { %1282 = shalt.err (!%p1279_p8)
}
  0x87   :  { %s1283_s23 = scalar_lea.vmem %s84_s11, 16  ;;  %s1287_s25 = scalar_lea.vmem %s84_s11, 32 }
  0x88   :  { %p1284_p9 = scmp.ne.s32.totalorder %s84_s11, %s1283_s23  ;;  %p1288_p10 = scmp.lt.s32.totalorder %s84_s11, %s84_s11 }
  0x89   :  { %p1289_p11 = scmp.lt.s32.totalorder %s1287_s25, %s1283_s23 }
  0x8b   :  { %p1290_p12 = por %p1289_p11, %p1288_p10 }
  0x8d   :  { %p1291_p13 = pnand %p1290_p12, %p1284_p9 }
  0x8f   :  { %1294 = shalt.err (!%p1291_p13)
}
  0x90   :  { %86 = dma.hbm_to_vmem [thread:$0]  %s1754_s7, 16, %s84_s11, [#allocation9]  }
  0x91   :  { %s1295_s27 = scalar_lea.hbm %s1757_s10, 256 }
  0x92   :  { %p1296_p0 = scmp.ne.s32.totalorder %s1757_s10, %s1295_s27  ;;  %p1299_p1 = scmp.lt.u32.totalorder %s1295_s27, %s1757_s10 }
  0x94   :  { %p1301_p2 = pnand %p1299_p1, %p1296_p0 }
  0x96   :  { %1304 = shalt.err (!%p1301_p2)
}
  0x97   :  { %s1305_s28 = scalar_lea.vmem %s1565_s20, 256  ;;  %p1310_p4 = scmp.lt.s32.totalorder %s1565_s20, %s1565_s20 }
  0x98   :  { %p1306_p3 = scmp.ne.s32.totalorder %s1565_s20, %s1305_s28  ;;  %p1311_p5 = scmp.lt.s32.totalorder %s1305_s28, %s1305_s28 }
  0x9a   :  { %p1312_p6 = por %p1311_p5, %p1310_p4 }
  0x9c   :  { %p1313_p7 = pnand %p1312_p6, %p1306_p3 }
  0x9e   :  { %1316 = shalt.err (!%p1313_p7)
}
  0x9f   :  { %110 = dma.hbm_to_vmem [thread:$0]  %s1757_s10, 256, %s1565_s20, [#allocation12], %s1379_s5, %s1379_s5, %s1380_s24  }
  0xa0   :  { %s1383_s1 = smov [#allocation16]   ;;  %s1317_s29 = scalar_lea.hbm %s1760_s13, 16 }
  0xa1   :  { %s129_s26 = sshll.u32 %s1383_s1, 4  ;;  %p1318_p8 = scmp.ne.s32.totalorder %s1760_s13, %s1317_s29  ;;  %s130_s26 = int_to_ptr.vmem [resolvable:$true] %s129_s26 }
  0xa2   :  { %p1321_p9 = scmp.lt.u32.totalorder %s1317_s29, %s1760_s13 }
  0xa4   :  { %p1323_p10 = pnand %p1321_p9, %p1318_p8 }
  0xa6   :  { %1326 = shalt.err (!%p1323_p10)
}
  0xa7   :  { %s1327_s22 = scalar_lea.vmem %s130_s26, 16  ;;  %s1331_s10 = scalar_lea.vmem %s130_s26, 32 }
  0xa8   :  { %p1328_p11 = scmp.ne.s32.totalorder %s130_s26, %s1327_s22  ;;  %p1332_p12 = scmp.lt.s32.totalorder %s130_s26, %s130_s26 }
  0xa9   :  { %p1333_p13 = scmp.lt.s32.totalorder %s1331_s10, %s1327_s22 }
  0xab   :  { %p1334_p0 = por %p1333_p13, %p1332_p12 }
  0xad   :  { %p1335_p1 = pnand %p1334_p0, %p1328_p11 }
  0xaf   :  { %1338 = shalt.err (!%p1335_p1)
}
  0xb0   :  { %132 = dma.hbm_to_vmem [thread:$0]  %s1760_s13, 16, %s130_s26, [#allocation15]  }
  0xb1   :  { %1361 = dma.done.wait [#allocation3], 128  }
  0xb2   :  { %1362 = vsyncadd [#allocation3], 4294967168 }
  0xb3   :  { %1363 = dma.done.wait [#allocation6], 384  }
  0xb4   :  { %1364 = vsyncadd [#allocation6], 4294966912 }
  0xb5   :  { %1365 = dma.done.wait [#allocation9], 32  }
  0xb6   :  { %1366 = vsyncadd [#allocation9], 4294967264 }
  0xb7   :  { %1367 = dma.done.wait [#allocation12], 272  }
  0xb8   :  { %1368 = vsyncadd [#allocation12], 4294967024 }
  0xb9   :  { %1369 = dma.done.wait [#allocation15], 32  }
  0xba   :  { %1370 = vsyncadd [#allocation15], 4294967264  ;;  %v1384_v0 = vmov 0.0|0.0   ;;  %vm1385_vm0 = vmmov 0   ;;  %v1386_v1 = vmov 0.0   ;;  %v169_v2 = vld [vmem:[#allocation7] sm:$0xff] }
  0xbb   :  { %1084 = vmatprep.subr.bf16.mxu0 %v1384_v0  ;;  %1003 = vmatprep.mubr.msk.f32.mxu0 %vm1385_vm0, %v1386_v1  ;;  %v170_v3 = vld [vmem:[#allocation7 + $0x8] sm:$0xff]  ;;  %v253_v5 = vld [vmem:[%s1751_s4] sm:$0xff]  ;;  %v254_v6 = vld [vmem:[%s1751_s4 + $0x8] sm:$0xff]  ;;  %vm178_vm1 = vcmask 130048   ;;  %vm264_vm2 = vcmask 261120   ;;  %vm922_vm3 = vcmask 64512  }
  0xbc   :  { %1087 = vmatprep.subr.bf16.mxu1 %v1384_v0  ;;  %1014 = vmatprep.mubr.msk.f32.mxu1 %vm1385_vm0, %v1386_v1  ;;  %v1085_v4 = vpack.c.bf16 %v170_v3, %v169_v2  ;;  %v1088_v7 = vpack.c.bf16 %v254_v6, %v253_v5  ;;  %v168_v8 = vld [vmem:[#allocation2] sm:$0xff]  ;;  %v255_v9 = vld [vmem:[%s1751_s4 + $0x10] sm:$0xff]  ;;  %v256_v10 = vld [vmem:[%s1751_s4 + $0x18] sm:$0xff] }
  0xbd   :  { %v1091_v11 = vpack.c.bf16 %v256_v10, %v255_v9  ;;  %v339_v12 = vld [vmem:[%s1753_s6] sm:$0xff]  ;;  %v340_v13 = vld [vmem:[%s1753_s6 + $0x8] sm:$0xff]  ;;  %v341_v20 = vld [vmem:[%s1753_s6 + $0x10] sm:$0xff] }
  0xbe   :  { %1086 = vmatpush3.bf16.msra.mxu0 %v1085_v4  ;;  %1089 = vmatpush3.bf16.msra.mxu1 %v1088_v7  ;;  %v1094_v14 = vpack.c.bf16 %v340_v13, %v339_v12  ;;  %v943_v15 = vld [vmem:[%s1750_s3] ss:$0 sm:$0xff]  ;;  %v342_v21 = vld [vmem:[%s1753_s6 + $0x18] sm:$0xff]  ;;  %v425_v24 = vld [vmem:[%s1755_s8 + $0x8] sm:$0xff] }
  0xbf   :  { %1093 = vmatprep.subr.bf16.mxu0 %v1384_v0  ;;  %1090 = vmatprep.subr.bf16.mxu1 %v1384_v0  ;;  %v1097_v22 = vpack.c.bf16 %v342_v21, %v341_v20  ;;  %v424_v23 = vld [vmem:[%s1755_s8] sm:$0xff]  ;;  %v510_v28 = vld [vmem:[#allocation13 + $0x8] sm:$0xff]  ;;  %v427_v36 = vld [vmem:[%s1755_s8 + $0x18] sm:$0xff] }
  0xc0   :  { %v1100_v25 = vpack.c.bf16 %v425_v24, %v424_v23  ;;  %v945_v26 = vld [vmem:[#allocation8] ss:$0 sm:$0xff]  ;;  %v509_v27 = vld [vmem:[#allocation13] sm:$0xff]  ;;  %v426_v35 = vld [vmem:[%s1755_s8 + $0x10] sm:$0xff] }
  0xc1   :  { %1004 = vmatmul.mubr.msk.f32.vlgmr.msra.gmra.mrb[0].mxu0 %vm178_vm1, %v168_v8  ;;  %v1106_v32 = vpack.c.bf16 %v510_v28, %v509_v27  ;;  %v508_v34 = vld [vmem:[#allocation5] sm:$0xff]  ;;  %v592_v37 = vld [vmem:[%s1759_s12] sm:$0xff]  ;;  %v1103_v38 = vpack.c.bf16 %v427_v36, %v426_v35  ;;  %v594_v41 = vld [vmem:[%s1759_s12 + $0x10] sm:$0xff] }
  0xc2   :  { %1025 = vmatprep.mubr.msk.f32.mxu0 %vm1385_vm0, %v1386_v1  ;;  %1092 = vmatpush3.bf16.msra.mxu1 %v1091_v11  ;;  %v593_v39 = vld [vmem:[%s1759_s12 + $0x8] sm:$0xff]  ;;  %v595_v42 = vld [vmem:[%s1759_s12 + $0x18] sm:$0xff]  ;;  %v947_v44 = vld [vmem:[#allocation10] ss:$0 sm:$0xff] }
  0xc3   :  { %1099 = vmatprep.subr.bf16.mxu1 %v1384_v0  ;;  %1095 = vmatpush3.bf16.msra.mxu0 %v1094_v14  ;;  %v1109_v40 = vpack.c.bf16 %v593_v39, %v592_v37  ;;  %v1112_v43 = vpack.c.bf16 %v595_v42, %v594_v41  ;;  %v677_v45 = vld [vmem:[%s1761_s14] sm:$0xff]  ;;  %v678_v46 = vld [vmem:[%s1761_s14 + $0x8] sm:$0xff]  ;;  %v951_v50 = vld [vmem:[#allocation14] ss:$0 sm:$0xff] }
  0xc4   :  { %1096 = vmatprep.subr.bf16.mxu0 %v1384_v0  ;;  %v1115_v51 = vpack.c.bf16 %v678_v46, %v677_v45  ;;  %v679_v57 = vld [vmem:[%s1761_s14 + $0x10] sm:$0xff]  ;;  %v680_v58 = vld [vmem:[%s1761_s14 + $0x18] sm:$0xff]  ;;  %v762_v60 = vld [vmem:[%s1763_s16] sm:$0xff] }
  0xc5   :  { %v1118_v59 = vpack.c.bf16 %v680_v58, %v679_v57  ;;  %v763_v61 = vld [vmem:[%s1763_s16 + $0x8] sm:$0xff]  ;;  %v953_v3 = vld [vmem:[#allocation16] ss:$0 sm:$0xff]  ;;  %v949_v5 = vld [vmem:[#allocation11] ss:$0 sm:$0xff] }
  0xc6   :  { %v1121_v62 = vpack.c.bf16 %v763_v61, %v762_v60  ;;  %v765_v10 = vld [vmem:[%s1763_s16 + $0x18] sm:$0xff]  ;;  %v955_v12 = vld [vmem:[%s1762_s15] ss:$0 sm:$0xff] }
  0xc7   :  { %1098 = vmatpush3.bf16.msra.mxu0 %v1097_v22 }
  0xc8   :  { %1105 = vmatprep.subr.bf16.mxu0 %v1384_v0 }
 0x194   :  { %v248_v16 = vpop.f32.mrb[0].mxu0 }
 0x195   :  { %v249_v17 = vadd.f32 %v943_v15, %v248_v16  ;;  %v1005_v18 = vpop.f32.mrb[1].mxu0 }
 0x197   :  { %v252_v19 = vmax.f32 %v249_v17, 0.0 }
 0x199   :  { %1015 = vmatmul.mubr.msk.f32.vlgmr.msra.gmra.mrb[0].mxu1 %vm264_vm2, %v252_v19 }
 0x19a   :  { %1036 = vmatprep.mubr.msk.f32.mxu1 %vm1385_vm0, %v1386_v1  ;;  %1101 = vmatpush3.bf16.msra.mxu1 %v1100_v25 }
 0x19b   :  { %1102 = vmatprep.subr.bf16.mxu1 %v1384_v0 }
 0x19e   :  { %1104 = vmatpush3.bf16.msra.mxu1 %v1103_v38 }
 0x19f   :  { %1114 = vmatprep.subr.bf16.mxu1 %v1384_v0 }
 0x26c   :  { %v334_v29 = vpop.f32.mrb[0].mxu1 }
 0x26d   :  { %v335_v30 = vadd.f32 %v945_v26, %v334_v29  ;;  %v1016_v31 = vpop.f32.mrb[1].mxu1 }
 0x26f   :  { %v338_v33 = vmax.f32 %v335_v30, 0.0 }
 0x271   :  { %1026 = vmatmul.mubr.msk.f32.vlgmr.msra.gmra.mrb[2].mxu0 %vm264_vm2, %v338_v33 }
 0x272   :  { %1107 = vmatpush3.bf16.msra.mxu0 %v1106_v32  ;;  %1043 = vmatprep.mubr.msk.f32.mxu0 %vm1385_vm0, %v1386_v1 }
 0x273   :  { %1108 = vmatprep.subr.bf16.mxu0 %v1384_v0 }
 0x275   :  { %1044 = vmatmul.mubr.msk.f32.vlgmr.msra.gmra.mrb[4].mxu0 %vm178_vm1, %v508_v34 }
 0x276   :  { %1054 = vmatprep.mubr.msk.f32.mxu0 %vm1385_vm0, %v1386_v1  ;;  %1110 = vmatpush3.bf16.msra.mxu0 %v1109_v40 }
 0x277   :  { %1111 = vmatprep.subr.bf16.mxu0 %v1384_v0 }
 0x27a   :  { %1113 = vmatpush3.bf16.msra.mxu0 %v1112_v43 }
 0x27b   :  { %1120 = vmatprep.subr.bf16.mxu0 %v1384_v0 }
 0x344   :  { %v419_v47 = vpop.f32.mrb[2].mxu0 }
 0x345   :  { %v420_v48 = vadd.f32 %v947_v44, %v419_v47  ;;  %v1027_v49 = vpop.f32.mrb[3].mxu0 }
 0x347   :  { %v423_v52 = vmax.f32 %v420_v48, 0.0 }
 0x348   :  { %v587_v53 = vpop.f32.mrb[4].mxu0 }
 0x349   :  { %v588_v54 = vadd.f32 %v951_v50, %v587_v53  ;;  %1037 = vmatmul.mubr.msk.f32.vlgmr.msra.gmra.mrb[2].mxu1 %vm264_vm2, %v423_v52  ;;  %v1045_v55 = vpop.f32.mrb[5].mxu0 }
 0x34a   :  { %1116 = vmatpush3.bf16.msra.mxu1 %v1115_v51  ;;  %1065 = vmatprep.mubr.msk.f32.mxu1 %vm1385_vm0, %v1386_v1 }
 0x34b   :  { %v591_v56 = vmax.f32 %v588_v54, 0.0  ;;  %1117 = vmatprep.subr.bf16.mxu1 %v1384_v0 }
 0x34d   :  { %1055 = vmatmul.mubr.msk.f32.vlgmr.msra.gmra.mrb[6].mxu0 %vm264_vm2, %v591_v56 }
 0x34e   :  { %1076 = vmatprep.mubr.msk.f32.mxu0 %vm1385_vm0, %v1386_v1  ;;  %1119 = vmatpush3.bf16.msra.mxu1 %v1118_v59 }
 0x34f   :  { %1079 = vmatprep.subr.mxu1 %v1386_v1  ;;  %1122 = vmatpush3.bf16.msra.mxu0 %v1121_v62 }
 0x350   :  { %1123 = vmatprep.subr.bf16.mxu0 %v1384_v0  ;;  %v764_v0 = vld [vmem:[%s1763_s16 + $0x10] sm:$0xff]  ;;  %s1387_s16 = smov [#allocation17]  }
 0x351   :  { %v1124_v11 = vpack.c.bf16 %v765_v10, %v764_v0  ;;  %s930_s2 = sshll.u32 %s1387_s16, 4  ;;  %s931_s2 = int_to_ptr.vmem [resolvable:$true] %s930_s2 }
 0x352   :  { %s1339_s15 = scalar_lea.vmem %s931_s2, 128  ;;  %p1344_p3 = scmp.lt.s32.totalorder %s931_s2, %s931_s2 }
 0x353   :  { %1125 = vmatpush3.bf16.msra.mxu0 %v1124_v11  ;;  %p1340_p2 = scmp.ne.s32.totalorder %s931_s2, %s1339_s15  ;;  %p1345_p4 = scmp.lt.s32.totalorder %s1339_s15, %s1339_s15 }
 0x355   :  { %p1346_p5 = por %p1345_p4, %p1344_p3 }
 0x357   :  { %p1347_p6 = pnand %p1346_p5, %p1340_p2 }
 0x41c   :  { %v504_v63 = vpop.f32.mrb[2].mxu1 }
 0x41d   :  { %v1038_v2 = vpop.f32.mrb[3].mxu1  ;;  %v505_v9 = vadd.f32 %v949_v5, %v504_v63 }
 0x420   :  { %v672_v4 = vpop.f32.mrb[6].mxu0 }
 0x421   :  { %v673_v6 = vadd.f32 %v953_v3, %v672_v4  ;;  %v1056_v7 = vpop.f32.mrb[7].mxu0 }
 0x423   :  { %v676_v8 = vmax.f32 %v673_v6, 0.0 }
 0x425   :  { %1066 = vmatmul.mubr.msk.f32.vlgmr.msra.gmra.mrb[4].mxu1 %vm264_vm2, %v676_v8 }
 0x426   :  { %1080 = vmatpush3.xpose.msk.msra.mxu1 %vm178_vm1, %v505_v9  ;;  %1081 = vmatprep.mubr.msk.f32.mxu1 %vm1385_vm0, %v1386_v1  ;;  %v957_v1 = vld [vmem:[%s1764_s17] ss:$0 sm:$0xff] }
 0x4f8   :  { %v757_v13 = vpop.f32.mrb[4].mxu1 }
 0x4f9   :  { %v758_v14 = vadd.f32 %v955_v12, %v757_v13  ;;  %v1067_v15 = vpop.f32.mrb[5].mxu1 }
 0x4fb   :  { %v761_v16 = vmax.f32 %v758_v14, 0.0 }
 0x4fd   :  { %1077 = vmatmul.mubr.msk.f32.vlgmr.msra.gmra.mrb[8].mxu0 %vm264_vm2, %v761_v16 }
 0x5d0   :  { %v842_v17 = vpop.f32.mrb[8].mxu0 }
 0x5d1   :  { %v843_v18 = vadd.f32 %v957_v1, %v842_v17  ;;  %v1078_v19 = vpop.f32.mrb[9].mxu0 }
 0x5d3   :  { %1082 = vmatmul.mubr.msk.f32.vlgmr.msra.gmra.mrb[6].mxu1 %vm178_vm1, %v843_v18 }
 0x6a6   :  { %v918_v20 = vpop.f32.mrb[6].mxu1 }
 0x6a7   :  { %v1083_v21 = vpop.f32.mrb[7].mxu1  ;;  %923 = vst.msk [vmem:[#allocation17] sm:$0xff] %vm922_vm3, %v918_v20 }
 0x6a8   :  { %1350 = shalt.err (!%p1347_p6)
}
 0x6a9   :  { %s1351_s28 = scalar_lea.hbm %s1765_s18, 128 }
 0x6aa   :  { %p1352_p7 = scmp.ne.s32.totalorder %s1765_s18, %s1351_s28  ;;  %p1355_p8 = scmp.lt.u32.totalorder %s1351_s28, %s1765_s18 }
 0x6ac   :  { %p1357_p9 = pnand %p1355_p8, %p1352_p7 }
 0x6ae   :  { %1360 = shalt.err (!%p1357_p9)
}
 0x6af   :  { %933 = dma.vmem_to_hbm [thread:$0]  %s931_s2, 128, %s1765_s18, [#allocation4]  }
 0x6b0   :  { %1371 = dma.done.wait [#allocation4], 128  }
 0x6b1   :  { %1372 = vsyncadd [#allocation4], 4294967168 }
 0x6b2   :  { %937 = vsyncpa [#allocation3], 1 }
 0x6b3   :  { %938 = vsyncpa [#allocation6], 1 }
 0x6b4   :  { %939 = vsyncpa [#allocation9], 1 }
 0x6b5   :  { %940 = vsyncpa [#allocation12], 1 }
 0x6b6   :  { %941 = vsyncpa [#allocation15], 1 }
 0x6b7   :  { %942 = vsyncpa [#allocation4], 1 }

</bundles_post_ra>
